<compile_context>
chip_gen: v6e
topology: v6e:2x2x1
jax: 0.10.0
libtpu: 0.0.40
codegen_flags: <defaults>
</compile_context>

<pallas_src>
import math

import jax
import jax.numpy as jnp
from jax.experimental import pallas as pl
from jax.experimental.pallas import tpu as pltpu

_LANES = 128
_MAX_WIDTH = 4096               # widest lane-dense view for the standalone kernel
_MIN_GRID_STEPS = 4             # only enforced on multi-TC (v7x) parts


def _gelu2_math(y):
    # x * sigmoid(1.702 x) == x * 0.5 * (1 + tanh(0.851 x))  (exact identity)
    # -> a single EUP op per element instead of exp + reciprocal.
    return y * (0.5 * (1.0 + jnp.tanh(0.851 * y)))


# ---------------------------------------------------------------------------
# Fused fc1 (Linear n_embd -> 4*n_embd) + GELU2 epilogue   (mlp1 up-projection)
# ---------------------------------------------------------------------------
def _fc1_gelu2_kernel(x_ref, w_ref, b_ref, o_ref, acc_ref):
    k = pl.program_id(2)

    @pl.when(k == 0)
    def _():
        acc_ref[...] = jnp.zeros_like(acc_ref)

    acc_ref[...] += jnp.dot(x_ref[...], w_ref[...],
                            preferred_element_type=jnp.float32)

    @pl.when(k == pl.num_programs(2) - 1)
    def _():
        y = acc_ref[...] + b_ref[...].astype(jnp.float32)
        o_ref[...] = _gelu2_math(y).astype(o_ref.dtype)


def _round_up(v, m):
    return ((v + m - 1) // m) * m


def _pick_tile(dim, candidates):
    for c in candidates:
        if dim % c == 0:
            return c
    return dim  # full-extent block


def linear_gelu2(x2d, w, b):
    """GELU2(x2d @ w + b) with the activation fused into the matmul finalize."""
    m, k = x2d.shape
    k2, n = w.shape
    assert k == k2 and b.shape == (n,)
    out_dtype = x2d.dtype

    tm = min(256, _round_up(m, 8))
    m_pad = _round_up(m, tm)
    if m_pad != m:
        x2d = jnp.pad(x2d, ((0, m_pad - m), (0, 0)))
    tn = _pick_tile(n, (512, 256, 128))
    tk = _pick_tile(k, (512, 256, 128))

    b2d = b.reshape(1, n)
    grid = (m_pad // tm, n // tn, k // tk)

    out = pl.pallas_call(
        _fc1_gelu2_kernel,
        out_shape=jax.ShapeDtypeStruct((m_pad, n), out_dtype),
        grid_spec=pltpu.PrefetchScalarGridSpec(
            num_scalar_prefetch=0,
            grid=grid,
            in_specs=[
                pl.BlockSpec((tm, tk), lambda i, j, kk: (i, kk)),
                pl.BlockSpec((tk, tn), lambda i, j, kk: (kk, j)),
                pl.BlockSpec((1, tn), lambda i, j, kk: (0, j)),
            ],
            out_specs=pl.BlockSpec((tm, tn), lambda i, j, kk: (i, j)),
            scratch_shapes=[pltpu.VMEM((tm, tn), jnp.float32)],
        ),
        compiler_params=pltpu.CompilerParams(
            dimension_semantics=("parallel", "parallel", "arbitrary")),
    )(x2d, w, b2d)
    if m_pad != m:
        out = out[:m]
    return out


# ---------------------------------------------------------------------------
# Standalone GELU2 (kept for call sites where fusion into a matmul epilogue
# is not possible) — lane-dense, generation-aware tiling.
# ---------------------------------------------------------------------------
def _chip_profile():
    kind = ""
    try:
        kind = jax.devices()[0].device_kind.lower()
    except Exception:
        pass
    is_v5e = ("v5 lite" in kind) or ("v5e" in kind) or ("v5litepod" in kind)
    is_v7 = "v7" in kind
    num_tc = 2 if is_v7 else 1
    target_block_bytes = (2 << 20) if is_v5e else (4 << 20)
    return num_tc, target_block_bytes, is_v5e


def _make_gelu2_kernel(compute_dtype):
    def kern(x_ref, o_ref):
        x = x_ref[...].astype(compute_dtype)
        o_ref[...] = _gelu2_math(x).astype(o_ref.dtype)
    return kern


def _pick_width(n):
    """Widest multiple of 128 (capped) dividing n, or None if 128 doesn't."""
    if n % _LANES != 0:
        return None
    best = _LANES
    w = _LANES * 2
    while w <= _MAX_WIDTH:
        if n % w == 0:
            best = w
        w *= 2
    return best


def _pick_block_rows(rows, width, itemsize, num_tc, target_block_bytes):
    sub = 8 * max(1, 4 // itemsize)   # packed sublane tile: 8 f32 / 16 bf16 / 32 i8
    if rows <= sub:
        return rows                   # full-extent block on the sublane dim
    target = max(1, target_block_bytes // (width * itemsize))
    br = min(rows, target)
    br = max(sub, (br // sub) * sub)
    if num_tc > 1 and rows > br:
        # Only on multi-TC parts: keep enough steps for both TensorCores and an
        # even step count so dimension_semantics=("parallel",) splits evenly.
        steps = max(_MIN_GRID_STEPS, pl.cdiv(rows, br))
        if steps % 2:
            steps += 1
        br = max(sub, _round_up(pl.cdiv(rows, steps), sub))
    return br


def _gelu2_2d(x2d, compute_dtype, num_tc, target_block_bytes):
    rows, cols = x2d.shape
    block_rows = _pick_block_rows(rows, cols, x2d.dtype.itemsize,
                                  num_tc, target_block_bytes)
    grid = (pl.cdiv(rows, block_rows),)
    block_bytes = block_rows * cols * x2d.dtype.itemsize
    # in + out, double-buffered, plus margin; stays within every generation's
    # scoped VMEM budget (and well under v7x's 64 MiB physical).
    vmem_limit = min(max(4 * block_bytes + (2 << 20), 16 << 20), 32 << 20)
    return pl.pallas_call(
        _make_gelu2_kernel(compute_dtype),
        out_shape=jax.ShapeDtypeStruct((rows, cols), x2d.dtype),
        grid_spec=pltpu.PrefetchScalarGridSpec(
            num_scalar_prefetch=0,
            grid=grid,
            in_specs=[pl.BlockSpec((block_rows, cols), lambda i: (i, 0))],
            out_specs=pl.BlockSpec((block_rows, cols), lambda i: (i, 0)),
        ),
        compiler_params=pltpu.CompilerParams(
            dimension_semantics=("parallel",),
            vmem_limit_bytes=vmem_limit),
    )(x2d)


def gelu2(x):
    """Elementwise x * sigmoid(1.702 x). Any shape/dtype; same shape/dtype out."""
    orig_shape = x.shape
    n = x.size
    if n == 0:
        return x
    num_tc, target_block_bytes, is_v5e = _chip_profile()
    compute_dtype = (x.dtype if (x.dtype == jnp.bfloat16 and not is_v5e)
                     else jnp.float32)

    width = _pick_width(n)
    if width is not None:
        out2d = _gelu2_2d(x.reshape(n // width, width),
                          compute_dtype, num_tc, target_block_bytes)
        return out2d.reshape(orig_shape)

    # Rare path (flat size not a multiple of 128): kernel on the aligned
    # prefix, plain jnp on the <128-element tail. No full-tensor pad/copy.
    flat = x.reshape(n)
    n_main = (n // _LANES) * _LANES
    pieces = []
    if n_main:
        w_main = _pick_width(n_main)
        pieces.append(
            _gelu2_2d(flat[:n_main].reshape(n_main // w_main, w_main),
                      compute_dtype, num_tc, target_block_bytes).reshape(n_main))
    tail = flat[n_main:]
    if tail.size:
        pieces.append(_gelu2_math(tail.astype(jnp.float32)).astype(x.dtype))
    return jnp.concatenate(pieces).reshape(orig_shape)


if __name__ == "__main__":
    key = jax.random.PRNGKey(0)
    k0, k1, k2, k3, k4 = jax.random.split(key, 5)

    def gelu2_ref(v):
        return v * jax.nn.sigmoid(1.702 * v)

    # --- fused fc1 + GELU2 (mlp1 up-projection) --------------------------------
    # Small shapes consistent with the module: dim = n_embd = 128 (hard-coded in
    # cswin_Transformer), batch=2, spatial 8x8 -> tokens = 128, hidden = 4*C = 512.
    b_, c_, h_, w_ = 2, 128, 8, 8
    tokens, hidden = b_ * h_ * w_, 4 * c_
    x_act = jax.random.normal(k0, (b_, c_, h_, w_), dtype=jnp.float32)
    x2d = x_act.transpose(0, 2, 3, 1).reshape(tokens, c_)   # b c h w -> (b h w) c
    w1 = jax.random.normal(k1, (c_, hidden), dtype=jnp.float32) / math.sqrt(c_)
    b1 = jax.random.normal(k2, (hidden,), dtype=jnp.float32) * 0.1

    y_fused = linear_gelu2(x2d, w1, b1)
    jax.block_until_ready(y_fused)
    y_ref = gelu2_ref(jnp.dot(x2d, w1, preferred_element_type=jnp.float32) + b1)
    assert y_fused.shape == (tokens, hidden) and y_fused.dtype == x2d.dtype
    err = float(jnp.max(jnp.abs(y_fused - y_ref)))
    scale = float(jnp.max(jnp.abs(y_ref))) + 1.0
    assert err <= 1e-2 * scale, f"fused fc1+GELU2 mismatch: {err}"

    # --- standalone GELU2 kernel ------------------------------------------------
    xa = jax.random.normal(k3, (2, 4, 16, 16), dtype=jnp.float32)
    ya = gelu2(xa)
    jax.block_until_ready(ya)
    assert ya.shape == xa.shape and ya.dtype == xa.dtype
    assert float(jnp.max(jnp.abs(ya - gelu2_ref(xa)))) < 1e-4

    xb = jax.random.normal(k4, (5, 7, 3), dtype=jnp.float32)   # odd flat size path
    yb = gelu2(xb)
    jax.block_until_ready(yb)
    assert yb.shape == xb.shape and yb.dtype == xb.dtype
    assert float(jnp.max(jnp.abs(yb - gelu2_ref(xb)))) < 1e-4

    print("KERNEL_OK")
</pallas_src>

<mosaic_0001>
module attributes {stable_mosaic.version = 11 : i64} {
  func.func @_fc1_gelu2_kernel(%arg0: i32, %arg1: i32, %arg2: i32, %arg3: memref<128x128xf32, #tpu.memory_space<vmem>>, %arg4: memref<128x512xf32, #tpu.memory_space<vmem>>, %arg5: memref<1x512xf32, #tpu.memory_space<vmem>>, %arg6: memref<128x512xf32, #tpu.memory_space<vmem>>, %arg7: memref<128x512xf32, #tpu.memory_space<vmem>>) attributes {dimension_semantics = [#tpu.dimension_semantics<parallel>, #tpu.dimension_semantics<parallel>, #tpu.dimension_semantics<arbitrary>], iteration_bounds = array<i64: 1, 1, 1>, scalar_prefetch = 0 : i64, scratch_operands = 1 : i64, tpu.core_type = #tpu.core_type<tc>, window_params = [{transform_indices = @transform_0, window_bounds = array<i64: 128, 128>}, {transform_indices = @transform_1, window_bounds = array<i64: 128, 512>}, {transform_indices = @transform_2, window_bounds = array<i64: 1, 512>}, {transform_indices = @transform_3, window_bounds = array<i64: 128, 512>}]} {
    %c0_i32 = arith.constant 0 : i32
    %0 = arith.cmpi eq, %arg2, %c0_i32 : i32
    %1 = arith.extui %0 : i1 to i32
    %c0_i32_0 = arith.constant 0 : i32
    %2 = arith.cmpi ne, %1, %c0_i32_0 : i32
    scf.if %2 {
      %cst_10 = arith.constant 0.000000e+00 : f32
      %12 = vector.broadcast %cst_10 : f32 to vector<128x512xf32>
      %c0_11 = arith.constant 0 : index
      %c0_12 = arith.constant 0 : index
      %13 = vector.load %arg7[%c0_11, %c0_12] : memref<128x512xf32, #tpu.memory_space<vmem>>, vector<128x512xf32>
      tpu.vector_store %arg7[%c0_11, %c0_12], %12 {strides = array<i32>} : memref<128x512xf32, #tpu.memory_space<vmem>>, vector<128x512xf32>,
    } else {
    }
    %c0 = arith.constant 0 : index
    %c0_1 = arith.constant 0 : index
    %3 = vector.load %arg7[%c0, %c0_1] : memref<128x512xf32, #tpu.memory_space<vmem>>, vector<128x512xf32>
    %c0_2 = arith.constant 0 : index
    %c0_3 = arith.constant 0 : index
    %4 = vector.load %arg3[%c0_2, %c0_3] : memref<128x128xf32, #tpu.memory_space<vmem>>, vector<128x128xf32>
    %c0_4 = arith.constant 0 : index
    %c0_5 = arith.constant 0 : index
    %5 = vector.load %arg4[%c0_4, %c0_5] : memref<128x512xf32, #tpu.memory_space<vmem>>, vector<128x512xf32>
    %cst = arith.constant dense<0.000000e+00> : vector<128x512xf32>
    %6 = tpu.matmul %4, %5, %cst {dimension_numbers = #tpu.dot_dimension_numbers<[1], [0], [0], [1], [0, 0, 1, 1], [], []>} : vector<128x128xf32>, vector<128x512xf32>, vector<128x512xf32> -> vector<128x512xf32>
    %7 = arith.addf %3, %6 : vector<128x512xf32>
    %c0_6 = arith.constant 0 : index
    %c0_7 = arith.constant 0 : index
    %8 = vector.load %arg7[%c0_6, %c0_7] : memref<128x512xf32, #tpu.memory_space<vmem>>, vector<128x512xf32>
    tpu.vector_store %arg7[%c0_6, %c0_7], %7 {strides = array<i32>} : memref<128x512xf32, #tpu.memory_space<vmem>>, vector<128x512xf32>,
    %c0_i32_8 = arith.constant 0 : i32
    %9 = arith.cmpi eq, %arg2, %c0_i32_8 : i32
    %10 = arith.extui %9 : i1 to i32
    %c0_i32_9 = arith.constant 0 : i32
    %11 = arith.cmpi ne, %10, %c0_i32_9 : i32
    scf.if %11 {
      %c0_10 = arith.constant 0 : index
      %c0_11 = arith.constant 0 : index
      %12 = vector.load %arg7[%c0_10, %c0_11] : memref<128x512xf32, #tpu.memory_space<vmem>>, vector<128x512xf32>
      %c0_12 = arith.constant 0 : index
      %c0_13 = arith.constant 0 : index
      %13 = vector.load %arg5[%c0_12, %c0_13] : memref<1x512xf32, #tpu.memory_space<vmem>>, vector<1x512xf32>
      %14 = vector.broadcast %13 : vector<1x512xf32> to vector<128x512xf32>
      %15 = arith.addf %12, %14 : vector<128x512xf32>
      %cst_14 = arith.constant 8.510000e-01 : f32
      %16 = vector.broadcast %cst_14 : f32 to vector<128x512xf32>
      %17 = arith.mulf %16, %15 : vector<128x512xf32>
      %18 = math.tanh %17 : vector<128x512xf32>
      %cst_15 = arith.constant 1.000000e+00 : f32
      %19 = vector.broadcast %cst_15 : f32 to vector<128x512xf32>
      %20 = arith.addf %19, %18 : vector<128x512xf32>
      %cst_16 = arith.constant 5.000000e-01 : f32
      %21 = vector.broadcast %cst_16 : f32 to vector<128x512xf32>
      %22 = arith.mulf %21, %20 : vector<128x512xf32>
      %23 = arith.mulf %15, %22 : vector<128x512xf32>
      %c0_17 = arith.constant 0 : index
      %c0_18 = arith.constant 0 : index
      %24 = vector.load %arg6[%c0_17, %c0_18] : memref<128x512xf32, #tpu.memory_space<vmem>>, vector<128x512xf32>
      tpu.vector_store %arg6[%c0_17, %c0_18], %23 {strides = array<i32>} : memref<128x512xf32, #tpu.memory_space<vmem>>, vector<128x512xf32>,
    } else {
    }
    return
  }
  func.func @transform_0(%arg0: i32, %arg1: i32, %arg2: i32) -> (i32, i32) {
    %c0_i32 = arith.constant 0 : i32
    return %arg0, %arg2 : i32, i32
  }
  func.func @transform_1(%arg0: i32, %arg1: i32, %arg2: i32) -> (i32, i32) {
    %c0_i32 = arith.constant 0 : i32
    return %arg2, %arg1 : i32, i32
  }
  func.func @transform_2(%arg0: i32, %arg1: i32, %arg2: i32) -> (i32, i32) {
    %c0_i32 = arith.constant 0 : i32
    %c0_i32_0 = arith.constant 0 : i32
    return %c0_i32, %arg1 : i32, i32
  }
  func.func @transform_3(%arg0: i32, %arg1: i32, %arg2: i32) -> (i32, i32) {
    %c0_i32 = arith.constant 0 : i32
    return %arg0, %arg1 : i32, i32
  }
}

</mosaic_0001>

<bundles_post_ra>
// kernel: tpu_custom_call.1
= control target key start
LH: loop header
LB: loop body
LE: loop exit
PB: predicated region body
PF: predicated region fallthrough
CT: control target
= control target key end

     0   :  { %8 = vsyncpa [#allocation4], 0  ;;  %s1994_s0 = inlined_call_operand.hbm [shape: f32[128,128], index: 0, kind: input, shape index: {}]   ;;  %s1995_s1 = inlined_call_operand.hbm [shape: f32[128,512], index: 1, kind: input, shape index: {}]   ;;  %s1996_s2 = inlined_call_operand.hbm [shape: f32[1,512], index: 2, kind: input, shape index: {}]   ;;  %s1997_s3 = inlined_call_operand.hbm [shape: f32[128,512], index: 3, kind: output, shape index: {}]  }
   0x1   :  { %9 = vsyncpa [#allocation7], 0 }
   0x2   :  { %10 = vsyncpa [#allocation5], 0  ;;  %s1494_s12 = smov [#allocation6]  }
   0x3   :  { %s28_s13 = sshll.u32 %s1494_s12, 4  ;;  %s29_s13 = int_to_ptr.vmem [resolvable:$true] %s28_s13 }
   0x4   :  { %s1416_s14 = scalar_lea.vmem %s29_s13, 8192  ;;  %p1421_p1 = scmp.lt.s32.totalorder %s29_s13, %s29_s13 }
   0x5   :  { %p1417_p0 = scmp.ne.s32.totalorder %s29_s13, %s1416_s14  ;;  %p1422_p2 = scmp.lt.s32.totalorder %s1416_s14, %s1416_s14 }
   0x7   :  { %p1423_p3 = por %p1422_p2, %p1421_p1 }
   0x9   :  { %p1424_p4 = pnand %p1423_p3, %p1417_p0 }
   0xb   :  { %1427 = shalt.err (!%p1424_p4)
}
   0xc   :  { %s1495_s15 = smov 512   ;;  %s1496_s16 = smov 32  }
   0xd   :  { %34 = dma.hbm_to_vmem [thread:$0]  %s1995_s1, 8192, %s29_s13, [#allocation7], %s1495_s15, %s1495_s15, %s1496_s16  }
   0xe   :  { %s1497_s19 = smov [#allocation3]  }
   0xf   :  { %s16_s20 = sshll.u32 %s1497_s19, 4  ;;  %s17_s20 = int_to_ptr.vmem [resolvable:$true] %s16_s20 }
  0x10   :  { %s1436_s21 = scalar_lea.vmem %s17_s20, 2048  ;;  %p1441_p6 = scmp.lt.s32.totalorder %s17_s20, %s17_s20 }
  0x11   :  { %p1437_p5 = scmp.ne.s32.totalorder %s17_s20, %s1436_s21  ;;  %p1442_p7 = scmp.lt.s32.totalorder %s1436_s21, %s1436_s21 }
  0x13   :  { %p1443_p8 = por %p1442_p7, %p1441_p6 }
  0x15   :  { %p1444_p9 = pnand %p1443_p8, %p1437_p5 }
  0x17   :  { %1447 = shalt.err (!%p1444_p9)
}
  0x18   :  { %s1498_s22 = smov 128   ;;  %s1499_s23 = smov 8  }
  0x19   :  { %22 = dma.hbm_to_vmem [thread:$0]  %s1994_s0, 2048, %s17_s20, [#allocation4], %s1498_s22, %s1498_s22, %s1499_s23  }
  0x1a   :  { %s1500_s26 = smov [#allocation8]  }
  0x1b   :  { %s41_s27 = sshll.u32 %s1500_s26, 4  ;;  %s42_s27 = int_to_ptr.vmem [resolvable:$true] %s41_s27 }
  0x1c   :  { %s1456_s1 = scalar_lea.vmem %s42_s27, 64  ;;  %p1461_p11 = scmp.lt.s32.totalorder %s42_s27, %s42_s27 }
  0x1d   :  { %p1457_p10 = scmp.ne.s32.totalorder %s42_s27, %s1456_s1  ;;  %p1462_p12 = scmp.lt.s32.totalorder %s1456_s1, %s1456_s1 }
  0x1f   :  { %p1463_p13 = por %p1462_p12, %p1461_p11 }
  0x21   :  { %p1464_p0 = pnand %p1463_p13, %p1457_p10 }
  0x23   :  { %1467 = shalt.err (!%p1464_p0)
}
  0x24   :  { %44 = dma.hbm_to_vmem [thread:$0]  %s1996_s2, 64, %s42_s27, [#allocation7]  }
  0x25   :  { %1488 = dma.done.wait [#allocation4], 2048  }
  0x26   :  { %1489 = vsyncadd [#allocation4], 4294965248 }
  0x27   :  { %1490 = dma.done.wait [#allocation7], 8256  }
  0x28   :  { %1491 = vsyncadd [#allocation7], 4294959040  ;;  %v1501_v0 = vmov 0.0   ;;  %v263_v1 = vld [vmem:[#allocation6 + $0x1e8] sm:$0xff]  ;;  %v265_v2 = vld [vmem:[#allocation6 + $0x1f8] sm:$0xff]  ;;  %s1502_s0 = smov [#allocation9]  }
  0x29   :  { %330 = vmatprep.mubr.f32.mxu0 %v1501_v0  ;;  %491 = vmatprep.mubr.f32.mxu1 %v1501_v0  ;;  %v262_v3 = vld [vmem:[#allocation6 + $0x1e0] sm:$0xff]  ;;  %v264_v4 = vld [vmem:[#allocation6 + $0x1f0] sm:$0xff]  ;;  %v259_v5 = vld [vmem:[#allocation6 + $0x1c8] sm:$0xff]  ;;  %s1258_s2 = sshll.u32 %s1502_s0, 4  ;;  %s1259_s2 = int_to_ptr.vmem [resolvable:$true] %s1258_s2 }
  0x2a   :  { %266 = vmatprep.subr.mxu0 %v263_v1  ;;  %427 = vmatprep.subr.mxu1 %v265_v2  ;;  %v261_v6 = vld [vmem:[#allocation6 + $0x1d8] sm:$0xff]  ;;  %v258_v7 = vld [vmem:[#allocation6 + $0x1c0] sm:$0xff]  ;;  %v260_v8 = vld [vmem:[#allocation6 + $0x1d0] sm:$0xff]  ;;  %s1468_s30 = scalar_lea.vmem %s1259_s2, 8192  ;;  %p1473_p2 = scmp.lt.s32.totalorder %s1259_s2, %s1259_s2 }
  0x2b   :  { %267 = vmatpush1.msra.mxu0 %v262_v3  ;;  %428 = vmatpush1.msra.mxu1 %v264_v4  ;;  %v255_v9 = vld [vmem:[#allocation6 + $0x1a8] sm:$0xff]  ;;  %v257_v10 = vld [vmem:[#allocation6 + $0x1b8] sm:$0xff]  ;;  %v254_v11 = vld [vmem:[#allocation6 + $0x1a0] sm:$0xff]  ;;  %p1469_p1 = scmp.ne.s32.totalorder %s1259_s2, %s1468_s30  ;;  %p1474_p3 = scmp.lt.s32.totalorder %s1468_s30, %s1468_s30 }
  0x2c   :  { %268 = vmatprep.subr.mxu0 %v259_v5  ;;  %429 = vmatprep.subr.mxu1 %v261_v6  ;;  %v256_v12 = vld [vmem:[#allocation6 + $0x1b0] sm:$0xff]  ;;  %v251_v13 = vld [vmem:[#allocation6 + $0x188] sm:$0xff]  ;;  %v253_v14 = vld [vmem:[#allocation6 + $0x198] sm:$0xff] }
  0x2d   :  { %269 = vmatpush1.msra.mxu0 %v258_v7  ;;  %430 = vmatpush1.msra.mxu1 %v260_v8  ;;  %v250_v15 = vld [vmem:[#allocation6 + $0x180] sm:$0xff]  ;;  %v252_v16 = vld [vmem:[#allocation6 + $0x190] sm:$0xff]  ;;  %v247_v17 = vld [vmem:[#allocation6 + $0x168] sm:$0xff]  ;;  %p1475_p4 = por %p1474_p3, %p1473_p2 }
  0x2e   :  { %270 = vmatprep.subr.mxu0 %v255_v9  ;;  %431 = vmatprep.subr.mxu1 %v257_v10  ;;  %v249_v18 = vld [vmem:[#allocation6 + $0x178] sm:$0xff]  ;;  %v246_v19 = vld [vmem:[#allocation6 + $0x160] sm:$0xff]  ;;  %v248_v20 = vld [vmem:[#allocation6 + $0x170] sm:$0xff] }
  0x2f   :  { %271 = vmatpush1.msra.mxu0 %v254_v11  ;;  %432 = vmatpush1.msra.mxu1 %v256_v12  ;;  %v243_v21 = vld [vmem:[#allocation6 + $0x148] sm:$0xff]  ;;  %v245_v22 = vld [vmem:[#allocation6 + $0x158] sm:$0xff]  ;;  %v242_v23 = vld [vmem:[#allocation6 + $0x140] sm:$0xff]  ;;  %p1476_p5 = pnand %p1475_p4, %p1469_p1 }
  0x30   :  { %272 = vmatprep.subr.mxu0 %v251_v13  ;;  %433 = vmatprep.subr.mxu1 %v253_v14  ;;  %v244_v24 = vld [vmem:[#allocation6 + $0x150] sm:$0xff]  ;;  %v239_v25 = vld [vmem:[#allocation6 + $0x128] sm:$0xff]  ;;  %v241_v26 = vld [vmem:[#allocation6 + $0x138] sm:$0xff] }
  0x31   :  { %273 = vmatpush1.msra.mxu0 %v250_v15  ;;  %434 = vmatpush1.msra.mxu1 %v252_v16  ;;  %v238_v27 = vld [vmem:[#allocation6 + $0x120] sm:$0xff]  ;;  %v240_v28 = vld [vmem:[#allocation6 + $0x130] sm:$0xff]  ;;  %v235_v29 = vld [vmem:[#allocation6 + $0x108] sm:$0xff] }
  0x32   :  { %274 = vmatprep.subr.mxu0 %v247_v17  ;;  %435 = vmatprep.subr.mxu1 %v249_v18  ;;  %v237_v30 = vld [vmem:[#allocation6 + $0x118] sm:$0xff]  ;;  %v234_v31 = vld [vmem:[#allocation6 + $0x100] sm:$0xff]  ;;  %v236_v32 = vld [vmem:[#allocation6 + $0x110] sm:$0xff]  ;;  %v785_v18 = vlaneseq }
  0x33   :  { %275 = vmatpush1.msra.mxu0 %v246_v19  ;;  %436 = vmatpush1.msra.mxu1 %v248_v20  ;;  %v231_v33 = vld [vmem:[#allocation6 + $0xe8] sm:$0xff]  ;;  %v233_v34 = vld [vmem:[#allocation6 + $0xf8] sm:$0xff]  ;;  %v230_v35 = vld [vmem:[#allocation6 + $0xe0] sm:$0xff] }
  0x34   :  { %276 = vmatprep.subr.mxu0 %v243_v21  ;;  %437 = vmatprep.subr.mxu1 %v245_v22  ;;  %v232_v36 = vld [vmem:[#allocation6 + $0xf0] sm:$0xff]  ;;  %v227_v37 = vld [vmem:[#allocation6 + $0xc8] sm:$0xff]  ;;  %v229_v38 = vld [vmem:[#allocation6 + $0xd8] sm:$0xff]  ;;  %v786_v19 = vshrl.u32 %v785_v18, 7 }
  0x35   :  { %277 = vmatpush1.msra.mxu0 %v242_v23  ;;  %438 = vmatpush1.msra.mxu1 %v244_v24  ;;  %v226_v39 = vld [vmem:[#allocation6 + $0xc0] sm:$0xff]  ;;  %v228_v40 = vld [vmem:[#allocation6 + $0xd0] sm:$0xff]  ;;  %v223_v41 = vld [vmem:[#allocation6 + $0xa8] sm:$0xff] }
  0x36   :  { %278 = vmatprep.subr.mxu0 %v239_v25  ;;  %439 = vmatprep.subr.mxu1 %v241_v26  ;;  %v225_v42 = vld [vmem:[#allocation6 + $0xb8] sm:$0xff]  ;;  %v222_v43 = vld [vmem:[#allocation6 + $0xa0] sm:$0xff]  ;;  %v224_v44 = vld [vmem:[#allocation6 + $0xb0] sm:$0xff]  ;;  %v787_v20 = vsub.s32 0, %v786_v19  ;;  %v795_v21 = vsub.s32 2, %v786_v19  ;;  %v791_v23 = vsub.s32 1, %v786_v19 }
  0x37   :  { %279 = vmatpush1.msra.mxu0 %v238_v27  ;;  %440 = vmatpush1.msra.mxu1 %v240_v28  ;;  %v219_v45 = vld [vmem:[#allocation6 + $0x88] sm:$0xff]  ;;  %v221_v46 = vld [vmem:[#allocation6 + $0x98] sm:$0xff]  ;;  %v218_v47 = vld [vmem:[#allocation6 + $0x80] sm:$0xff]  ;;  %v799_v24 = vsub.s32 3, %v786_v19 }
  0x38   :  { %280 = vmatprep.subr.mxu0 %v235_v29  ;;  %441 = vmatprep.subr.mxu1 %v237_v30  ;;  %v220_v48 = vld [vmem:[#allocation6 + $0x90] sm:$0xff]  ;;  %v215_v49 = vld [vmem:[#allocation6 + $0x68] sm:$0xff]  ;;  %v217_v50 = vld [vmem:[#allocation6 + $0x78] sm:$0xff] }
  0x39   :  { %281 = vmatpush1.msra.mxu0 %v234_v31  ;;  %442 = vmatpush1.msra.mxu1 %v236_v32  ;;  %v214_v51 = vld [vmem:[#allocation6 + $0x60] sm:$0xff]  ;;  %v216_v52 = vld [vmem:[#allocation6 + $0x70] sm:$0xff]  ;;  %v211_v53 = vld [vmem:[#allocation6 + $0x48] sm:$0xff] }
  0x3a   :  { %282 = vmatprep.subr.mxu0 %v231_v33  ;;  %443 = vmatprep.subr.mxu1 %v233_v34  ;;  %v213_v54 = vld [vmem:[#allocation6 + $0x58] sm:$0xff]  ;;  %v210_v55 = vld [vmem:[#allocation6 + $0x40] sm:$0xff]  ;;  %v212_v56 = vld [vmem:[#allocation6 + $0x50] sm:$0xff] }
  0x3b   :  { %283 = vmatpush1.msra.mxu0 %v230_v35  ;;  %444 = vmatpush1.msra.mxu1 %v232_v36  ;;  %v207_v57 = vld [vmem:[#allocation6 + $0x28] sm:$0xff]  ;;  %v209_v58 = vld [vmem:[#allocation6 + $0x38] sm:$0xff]  ;;  %v206_v59 = vld [vmem:[#allocation6 + $0x20] sm:$0xff] }
  0x3c   :  { %284 = vmatprep.subr.mxu0 %v227_v37  ;;  %445 = vmatprep.subr.mxu1 %v229_v38  ;;  %v208_v60 = vld [vmem:[#allocation6 + $0x30] sm:$0xff]  ;;  %v203_v61 = vld [vmem:[#allocation6 + $0x8] sm:$0xff]  ;;  %v205_v62 = vld [vmem:[#allocation6 + $0x18] sm:$0xff] }
  0x3d   :  { %285 = vmatpush1.msra.mxu0 %v226_v39  ;;  %446 = vmatpush1.msra.mxu1 %v228_v40  ;;  %v202_v63 = vld [vmem:[#allocation6] sm:$0xff]  ;;  %v204_v1 = vld [vmem:[#allocation6 + $0x10] sm:$0xff]  ;;  %v187_v3 = vld [vmem:[#allocation3 + $0x8] sm:$0xff] }
  0x3e   :  { %286 = vmatprep.subr.mxu0 %v223_v41  ;;  %447 = vmatprep.subr.mxu1 %v225_v42  ;;  %v186_v2 = vld [vmem:[#allocation3] sm:$0xff]  ;;  %v188_v4 = vld [vmem:[#allocation3 + $0x10] sm:$0xff]  ;;  %v189_v5 = vld [vmem:[#allocation3 + $0x18] sm:$0xff] }
  0x3f   :  { %287 = vmatpush1.msra.mxu0 %v222_v43  ;;  %448 = vmatpush1.msra.mxu1 %v224_v44  ;;  %v190_v6 = vld [vmem:[#allocation3 + $0x20] sm:$0xff]  ;;  %v191_v7 = vld [vmem:[#allocation3 + $0x28] sm:$0xff]  ;;  %v192_v8 = vld [vmem:[#allocation3 + $0x30] sm:$0xff] }
  0x40   :  { %288 = vmatprep.subr.mxu0 %v219_v45  ;;  %449 = vmatprep.subr.mxu1 %v221_v46  ;;  %v193_v9 = vld [vmem:[#allocation3 + $0x38] sm:$0xff]  ;;  %v194_v10 = vld [vmem:[#allocation3 + $0x40] sm:$0xff]  ;;  %v195_v11 = vld [vmem:[#allocation3 + $0x48] sm:$0xff] }
  0x41   :  { %289 = vmatpush1.msra.mxu0 %v218_v47  ;;  %450 = vmatpush1.msra.mxu1 %v220_v48  ;;  %v196_v12 = vld [vmem:[#allocation3 + $0x50] sm:$0xff]  ;;  %v197_v13 = vld [vmem:[#allocation3 + $0x58] sm:$0xff]  ;;  %v198_v14 = vld [vmem:[#allocation3 + $0x60] sm:$0xff] }
  0x42   :  { %290 = vmatprep.subr.mxu0 %v215_v49  ;;  %451 = vmatprep.subr.mxu1 %v217_v50  ;;  %v199_v15 = vld [vmem:[#allocation3 + $0x68] sm:$0xff]  ;;  %v200_v16 = vld [vmem:[#allocation3 + $0x70] sm:$0xff]  ;;  %v201_v17 = vld [vmem:[#allocation3 + $0x78] sm:$0xff] }
  0x43   :  { %291 = vmatpush1.msra.mxu0 %v214_v51  ;;  %452 = vmatpush1.msra.mxu1 %v216_v52  ;;  %v783_v22 = vld [vmem:[#allocation8] sm:$0xf] }
  0x44   :  { %292 = vmatprep.subr.mxu0 %v211_v53  ;;  %453 = vmatprep.subr.mxu1 %v213_v54  ;;  %v1567_v25 = vrot.slane %v783_v22, %v787_v20  ;;  %v1569_v26 = vrot.slane %v783_v22, %v795_v21  ;;  %v1571_v27 = vrot.slane %v783_v22, %v791_v23 }
  0x45   :  { %293 = vmatpush1.msra.mxu0 %v210_v55  ;;  %454 = vmatpush1.msra.mxu1 %v212_v56  ;;  %v1573_v28 = vrot.slane %v783_v22, %v799_v24 }
  0x46   :  { %294 = vmatprep.subr.mxu0 %v207_v57  ;;  %455 = vmatprep.subr.mxu1 %v209_v58 }
  0x47   :  { %295 = vmatpush1.msra.mxu0 %v206_v59  ;;  %456 = vmatpush1.msra.mxu1 %v208_v60 }
  0x48   :  { %296 = vmatprep.subr.mxu0 %v203_v61  ;;  %457 = vmatprep.subr.mxu1 %v205_v62 }
  0x49   :  { %297 = vmatpush1.msra.mxu0 %v202_v63  ;;  %458 = vmatpush1.msra.mxu1 %v204_v1 }
  0x4a   :  { %331 = vmatmul.mubr.f32.vlgmr.msra.gmra.mxu0 %v186_v2  ;;  %492 = vmatmul.mubr.f32.vlgmr.msra.gmra.mxu1 %v186_v2 }
  0x4b   :  { %336 = vmatprep.mubr.f32.mxu0 %v1501_v0  ;;  %497 = vmatprep.mubr.f32.mxu1 %v1501_v0 }
  0x4e   :  { %337 = vmatmul.mubr.f32.gmra.mxu0 %v187_v3  ;;  %498 = vmatmul.mubr.f32.gmra.mxu1 %v187_v3 }
  0x4f   :  { %342 = vmatprep.mubr.f32.mxu0 %v1501_v0  ;;  %503 = vmatprep.mubr.f32.mxu1 %v1501_v0 }
  0x52   :  { %343 = vmatmul.mubr.f32.gmra.mxu0 %v188_v4  ;;  %504 = vmatmul.mubr.f32.gmra.mxu1 %v188_v4 }
  0x53   :  { %348 = vmatprep.mubr.f32.mxu0 %v1501_v0  ;;  %509 = vmatprep.mubr.f32.mxu1 %v1501_v0 }
  0x56   :  { %349 = vmatmul.mubr.f32.gmra.mxu0 %v189_v5  ;;  %510 = vmatmul.mubr.f32.gmra.mxu1 %v189_v5 }
  0x57   :  { %354 = vmatprep.mubr.f32.mxu0 %v1501_v0  ;;  %515 = vmatprep.mubr.f32.mxu1 %v1501_v0 }
  0x5a   :  { %355 = vmatmul.mubr.f32.gmra.mxu0 %v190_v6  ;;  %516 = vmatmul.mubr.f32.gmra.mxu1 %v190_v6 }
  0x5b   :  { %360 = vmatprep.mubr.f32.mxu0 %v1501_v0  ;;  %521 = vmatprep.mubr.f32.mxu1 %v1501_v0 }
  0x5e   :  { %361 = vmatmul.mubr.f32.gmra.mxu0 %v191_v7  ;;  %522 = vmatmul.mubr.f32.gmra.mxu1 %v191_v7 }
  0x5f   :  { %366 = vmatprep.mubr.f32.mxu0 %v1501_v0  ;;  %527 = vmatprep.mubr.f32.mxu1 %v1501_v0 }
  0x62   :  { %367 = vmatmul.mubr.f32.gmra.mxu0 %v192_v8  ;;  %528 = vmatmul.mubr.f32.gmra.mxu1 %v192_v8 }
  0x63   :  { %372 = vmatprep.mubr.f32.mxu0 %v1501_v0  ;;  %533 = vmatprep.mubr.f32.mxu1 %v1501_v0 }
  0x66   :  { %373 = vmatmul.mubr.f32.gmra.mxu0 %v193_v9  ;;  %534 = vmatmul.mubr.f32.gmra.mxu1 %v193_v9 }
  0x67   :  { %378 = vmatprep.mubr.f32.mxu0 %v1501_v0  ;;  %539 = vmatprep.mubr.f32.mxu1 %v1501_v0 }
  0x6a   :  { %379 = vmatmul.mubr.f32.gmra.mxu0 %v194_v10  ;;  %540 = vmatmul.mubr.f32.gmra.mxu1 %v194_v10 }
  0x6b   :  { %384 = vmatprep.mubr.f32.mxu0 %v1501_v0  ;;  %545 = vmatprep.mubr.f32.mxu1 %v1501_v0 }
  0x6e   :  { %385 = vmatmul.mubr.f32.gmra.mxu0 %v195_v11  ;;  %546 = vmatmul.mubr.f32.gmra.mxu1 %v195_v11 }
  0x6f   :  { %390 = vmatprep.mubr.f32.mxu0 %v1501_v0  ;;  %551 = vmatprep.mubr.f32.mxu1 %v1501_v0 }
  0x72   :  { %391 = vmatmul.mubr.f32.gmra.mxu0 %v196_v12  ;;  %552 = vmatmul.mubr.f32.gmra.mxu1 %v196_v12 }
  0x73   :  { %396 = vmatprep.mubr.f32.mxu0 %v1501_v0  ;;  %557 = vmatprep.mubr.f32.mxu1 %v1501_v0 }
  0x76   :  { %397 = vmatmul.mubr.f32.gmra.mxu0 %v197_v13  ;;  %558 = vmatmul.mubr.f32.gmra.mxu1 %v197_v13 }
  0x77   :  { %402 = vmatprep.mubr.f32.mxu0 %v1501_v0  ;;  %563 = vmatprep.mubr.f32.mxu1 %v1501_v0 }
  0x7a   :  { %403 = vmatmul.mubr.f32.gmra.mxu0 %v198_v14  ;;  %564 = vmatmul.mubr.f32.gmra.mxu1 %v198_v14 }
  0x7b   :  { %408 = vmatprep.mubr.f32.mxu0 %v1501_v0  ;;  %569 = vmatprep.mubr.f32.mxu1 %v1501_v0 }
  0x7e   :  { %409 = vmatmul.mubr.f32.gmra.mxu0 %v199_v15  ;;  %570 = vmatmul.mubr.f32.gmra.mxu1 %v199_v15 }
  0x7f   :  { %414 = vmatprep.mubr.f32.mxu0 %v1501_v0  ;;  %575 = vmatprep.mubr.f32.mxu1 %v1501_v0 }
  0x82   :  { %415 = vmatmul.mubr.f32.gmra.mxu0 %v200_v16  ;;  %576 = vmatmul.mubr.f32.gmra.mxu1 %v200_v16 }
  0x83   :  { %420 = vmatprep.mubr.f32.mxu0 %v1501_v0  ;;  %581 = vmatprep.mubr.f32.mxu1 %v1501_v0 }
  0x86   :  { %421 = vmatmul.mubr.f32.gmra.mxu0 %v201_v17  ;;  %582 = vmatmul.mubr.f32.gmra.mxu1 %v201_v17 }
 0x10a   :  { %v332_v29 = vpop.f32.mrf.mxu0  ;;  %v493_v0 = vpop.f32.mrf.mxu1 }
 0x10b   :  { %v1576_v30 = vadd.f32 %v1567_v25, %v332_v29  ;;  %v1579_v31 = vadd.f32 %v1569_v26, %v493_v0 }
 0x10c   :  { %v334_v32 = vpop.f32.mrf.mxu0  ;;  %v495_v33 = vpop.f32.mrf.mxu1 }
 0x10d   :  { %v869_v34 = vmul.f32 0.851, %v1576_v30  ;;  %v871_v35 = vmul.f32 0.851, %v1579_v31  ;;  %v1584_v36 = vadd.f32 %v1571_v27, %v334_v32  ;;  %v1587_v37 = vadd.f32 %v1573_v28, %v495_v33 }
 0x10e   :  { %v338_v38 = vpop.f32.mrf.mxu0  ;;  %v499_v39 = vpop.f32.mrf.mxu1 }
 0x10f   :  { %1280 = vtanh.f32 %v869_v34  ;;  %v870_v40 = vmul.f32 0.851, %v1584_v36  ;;  %v872_v41 = vmul.f32 0.851, %v1587_v37  ;;  %v1592_v42 = vadd.f32 %v1567_v25, %v338_v38 }
 0x110   :  { %1282 = vtanh.f32 %v871_v35  ;;  %v1595_v43 = vadd.f32 %v1569_v26, %v499_v39  ;;  %v340_v44 = vpop.f32.mrf.mxu0  ;;  %v501_v45 = vpop.f32.mrf.mxu1 }
 0x111   :  { %1284 = vtanh.f32 %v870_v40  ;;  %v873_v46 = vmul.f32 0.851, %v1592_v42  ;;  %v1599_v47 = vadd.f32 %v1571_v27, %v340_v44  ;;  %v1602_v48 = vadd.f32 %v1573_v28, %v501_v45 }
 0x112   :  { %1286 = vtanh.f32 %v872_v41  ;;  %v875_v49 = vmul.f32 0.851, %v1595_v43  ;;  %v344_v50 = vpop.f32.mrf.mxu0  ;;  %v505_v51 = vpop.f32.mrf.mxu1 }
 0x113   :  { %1288 = vtanh.f32 %v873_v46  ;;  %v874_v52 = vmul.f32 0.851, %v1599_v47  ;;  %v876_v53 = vmul.f32 0.851, %v1602_v48  ;;  %v1608_v54 = vadd.f32 %v1567_v25, %v344_v50 }
 0x114   :  { %1290 = vtanh.f32 %v875_v49  ;;  %v1611_v55 = vadd.f32 %v1569_v26, %v505_v51  ;;  %v346_v56 = vpop.f32.mrf.mxu0  ;;  %v507_v57 = vpop.f32.mrf.mxu1 }
 0x115   :  { %1292 = vtanh.f32 %v874_v52  ;;  %v877_v58 = vmul.f32 0.851, %v1608_v54  ;;  %v1615_v59 = vadd.f32 %v1571_v27, %v346_v56  ;;  %v1618_v60 = vadd.f32 %v1573_v28, %v507_v57 }
 0x116   :  { %1294 = vtanh.f32 %v876_v53  ;;  %v879_v61 = vmul.f32 0.851, %v1611_v55  ;;  %v350_v62 = vpop.f32.mrf.mxu0  ;;  %v511_v63 = vpop.f32.mrf.mxu1 }
 0x117   :  { %1296 = vtanh.f32 %v877_v58  ;;  %v878_v1 = vmul.f32 0.851, %v1615_v59  ;;  %v880_v2 = vmul.f32 0.851, %v1618_v60  ;;  %v1624_v3 = vadd.f32 %v1567_v25, %v350_v62 }
 0x118   :  { %1298 = vtanh.f32 %v879_v61  ;;  %v1627_v4 = vadd.f32 %v1569_v26, %v511_v63  ;;  %v352_v5 = vpop.f32.mrf.mxu0  ;;  %v513_v6 = vpop.f32.mrf.mxu1 }
 0x119   :  { %1300 = vtanh.f32 %v878_v1  ;;  %v881_v7 = vmul.f32 0.851, %v1624_v3  ;;  %v1631_v8 = vadd.f32 %v1571_v27, %v352_v5  ;;  %v1634_v9 = vadd.f32 %v1573_v28, %v513_v6 }
 0x11a   :  { %1302 = vtanh.f32 %v880_v2  ;;  %v883_v10 = vmul.f32 0.851, %v1627_v4  ;;  %v356_v11 = vpop.f32.mrf.mxu0  ;;  %v517_v12 = vpop.f32.mrf.mxu1 }
 0x11b   :  { %1304 = vtanh.f32 %v881_v7  ;;  %v882_v13 = vmul.f32 0.851, %v1631_v8  ;;  %v884_v14 = vmul.f32 0.851, %v1634_v9  ;;  %v1640_v15 = vadd.f32 %v1567_v25, %v356_v11 }
 0x11c   :  { %v1281_v16 = vpop.eup %1280  ;;  %1306 = vtanh.f32 %v883_v10  ;;  %v1643_v17 = vadd.f32 %v1569_v26, %v517_v12  ;;  %v358_v18 = vpop.f32.mrf.mxu0 }
 0x11d   :  { %v519_v19 = vpop.f32.mrf.mxu1  ;;  %v1283_v20 = vpop.eup %1282  ;;  %v997_v21 = vadd.f32 1.0, %v1281_v16  ;;  %1308 = vtanh.f32 %v882_v13  ;;  %v885_v22 = vmul.f32 0.851, %v1640_v15  ;;  %v1647_v23 = vadd.f32 %v1571_v27, %v358_v18 }
 0x11e   :  { %v1285_v24 = vpop.eup %1284  ;;  %v999_v29 = vadd.f32 1.0, %v1283_v20  ;;  %1310 = vtanh.f32 %v884_v14  ;;  %v887_v0 = vmul.f32 0.851, %v1643_v17  ;;  %v1651_v32 = vadd.f32 %v1573_v28, %v519_v19  ;;  %v362_v33 = vpop.f32.mrf.mxu0 }
 0x11f   :  { %v523_v34 = vpop.f32.mrf.mxu1  ;;  %v1287_v35 = vpop.eup %1286  ;;  %v1061_v38 = vmul.f32 0.5, %v997_v21  ;;  %v998_v39 = vadd.f32 1.0, %v1285_v24  ;;  %1312 = vtanh.f32 %v885_v22  ;;  %v886_v40 = vmul.f32 0.851, %v1647_v23 }
 0x120   :  { %v1289_v41 = vpop.eup %1288  ;;  %v1063_v44 = vmul.f32 0.5, %v999_v29  ;;  %v1000_v45 = vadd.f32 1.0, %v1287_v35  ;;  %1314 = vtanh.f32 %v887_v0  ;;  %v888_v46 = vmul.f32 0.851, %v1651_v32  ;;  %v364_v49 = vpop.f32.mrf.mxu0 }
 0x121   :  { %v1655_v50 = vpop.f32.mrf.mxu1  ;;  %v1291_v51 = vpop.eup %1290  ;;  %v1125_v52 = vmul.f32 %v1061_v38, %v1576_v30  ;;  %v1062_v53 = vmul.f32 0.5, %v998_v39  ;;  %v1001_v56 = vadd.f32 1.0, %v1289_v41  ;;  %1316 = vtanh.f32 %v886_v40 }
 0x122   :  { %v1293_v57 = vpop.eup %1292  ;;  %v1127_v58 = vmul.f32 %v1063_v44, %v1579_v31  ;;  %v1064_v61 = vmul.f32 0.5, %v1000_v45  ;;  %v1003_v62 = vadd.f32 1.0, %v1291_v51  ;;  %1318 = vtanh.f32 %v888_v46  ;;  %v1659_v63 = vpop.f32.mrf.mxu0 }
 0x123   :  { %v1661_v1 = vpop.f32.mrf.mxu1  ;;  %v1295_v2 = vpop.eup %1294  ;;  %1189 = vst [vmem:[#allocation9] sm:$0xff] %v1125_v52  ;;  %v1126_v5 = vmul.f32 %v1062_v53, %v1584_v36  ;;  %v1065_v6 = vmul.f32 0.5, %v1001_v56  ;;  %v1002_v7 = vadd.f32 1.0, %v1293_v57  ;;  %v1665_v30 = vadd.f32 %v1567_v25, %v362_v33 }
 0x124   :  { %v1297_v10 = vpop.eup %1296  ;;  %1191 = vst [vmem:[#allocation9 + $0x10] sm:$0xff] %v1127_v58  ;;  %v1128_v31 = vmul.f32 %v1064_v61, %v1587_v37  ;;  %v1067_v11 = vmul.f32 0.5, %v1003_v62  ;;  %v1004_v12 = vadd.f32 1.0, %v1295_v2  ;;  %v1669_v13 = vadd.f32 %v1569_v26, %v523_v34  ;;  %v1671_v14 = vpop.f32.mrf.mxu0 }
 0x125   :  { %v1673_v16 = vpop.f32.mrf.mxu1  ;;  %v1299_v18 = vpop.eup %1298  ;;  %1190 = vst [vmem:[#allocation9 + $0x8] sm:$0xff] %v1126_v5  ;;  %v1129_v36 = vmul.f32 %v1065_v6, %v1592_v42  ;;  %v1066_v19 = vmul.f32 0.5, %v1002_v7  ;;  %v1005_v20 = vadd.f32 1.0, %v1297_v10  ;;  %v889_v21 = vmul.f32 0.851, %v1665_v30 }
 0x126   :  { %v1301_v22 = vpop.eup %1300  ;;  %1192 = vst [vmem:[#allocation9 + $0x18] sm:$0xff] %v1128_v31  ;;  %v1131_v37 = vmul.f32 %v1067_v11, %v1595_v43  ;;  %v1068_v24 = vmul.f32 0.5, %v1004_v12  ;;  %v1007_v29 = vadd.f32 1.0, %v1299_v18  ;;  %v891_v0 = vmul.f32 0.851, %v1669_v13  ;;  %v1679_v33 = vpop.f32.mrf.mxu0 }
 0x127   :  { %v1681_v34 = vpop.f32.mrf.mxu1  ;;  %v1303_v35 = vpop.eup %1302  ;;  %1193 = vst [vmem:[#allocation9 + $0x20] sm:$0xff] %v1129_v36  ;;  %v1130_v42 = vmul.f32 %v1066_v19, %v1599_v47  ;;  %v1069_v38 = vmul.f32 0.5, %v1005_v20  ;;  %v1006_v39 = vadd.f32 1.0, %v1301_v22  ;;  %1320 = vtanh.f32 %v889_v21 }
 0x128   :  { %v1305_v40 = vpop.eup %1304  ;;  %1195 = vst [vmem:[#allocation9 + $0x30] sm:$0xff] %v1131_v37  ;;  %v1132_v41 = vmul.f32 %v1068_v24, %v1602_v48  ;;  %v1071_v43 = vmul.f32 0.5, %v1007_v29  ;;  %v1008_v44 = vadd.f32 1.0, %v1303_v35  ;;  %1322 = vtanh.f32 %v891_v0  ;;  %v1685_v45 = vpop.f32.mrf.mxu0 }
 0x129   :  { %v1687_v46 = vpop.f32.mrf.mxu1  ;;  %v1307_v51 = vpop.eup %1306  ;;  %1194 = vst [vmem:[#allocation9 + $0x28] sm:$0xff] %v1130_v42  ;;  %v1133_v52 = vmul.f32 %v1069_v38, %v1608_v54  ;;  %v1070_v53 = vmul.f32 0.5, %v1006_v39  ;;  %v1009_v47 = vadd.f32 1.0, %v1305_v40  ;;  %v1691_v56 = vadd.f32 %v1571_v27, %v364_v49 }
 0x12a   :  { %v1309_v57 = vpop.eup %1308  ;;  %1196 = vst [vmem:[#allocation9 + $0x38] sm:$0xff] %v1132_v41  ;;  %v1135_v48 = vmul.f32 %v1071_v43, %v1611_v55  ;;  %v1072_v58 = vmul.f32 0.5, %v1008_v44  ;;  %v1011_v61 = vadd.f32 1.0, %v1307_v51  ;;  %v1696_v62 = vadd.f32 %v1573_v28, %v1655_v50  ;;  %v1698_v2 = vpop.f32.mrf.mxu0 }
 0x12b   :  { %v1700_v5 = vpop.f32.mrf.mxu1  ;;  %v1311_v54 = vpop.eup %1310  ;;  %1197 = vst [vmem:[#allocation9 + $0x40] sm:$0xff] %v1133_v52  ;;  %v1134_v6 = vmul.f32 %v1070_v53, %v1615_v59  ;;  %v1073_v49 = vmul.f32 0.5, %v1009_v47  ;;  %v1010_v7 = vadd.f32 1.0, %v1309_v57  ;;  %v890_v10 = vmul.f32 0.851, %v1691_v56 }
 0x12c   :  { %v1313_v31 = vpop.eup %1312  ;;  %1199 = vst [vmem:[#allocation9 + $0x50] sm:$0xff] %v1135_v48  ;;  %v1136_v55 = vmul.f32 %v1072_v58, %v1618_v60  ;;  %v1075_v11 = vmul.f32 0.5, %v1011_v61  ;;  %v1012_v12 = vadd.f32 1.0, %v1311_v54  ;;  %v892_v50 = vmul.f32 0.851, %v1696_v62  ;;  %v1706_v18 = vpop.f32.mrf.mxu0 }
 0x12d   :  { %v1708_v36 = vpop.f32.mrf.mxu1  ;;  %v1315_v19 = vpop.eup %1314  ;;  %1198 = vst [vmem:[#allocation9 + $0x48] sm:$0xff] %v1134_v6  ;;  %v1137_v59 = vmul.f32 %v1073_v49, %v1624_v3  ;;  %v1074_v20 = vmul.f32 0.5, %v1010_v7  ;;  %v1013_v21 = vadd.f32 1.0, %v1313_v31  ;;  %1324 = vtanh.f32 %v890_v10 }
 0x12e   :  { %v1317_v22 = vpop.eup %1316  ;;  %1200 = vst [vmem:[#allocation9 + $0x58] sm:$0xff] %v1136_v55  ;;  %v1139_v37 = vmul.f32 %v1075_v11, %v1627_v4  ;;  %v1076_v60 = vmul.f32 0.5, %v1012_v12  ;;  %v1015_v24 = vadd.f32 1.0, %v1315_v19  ;;  %1326 = vtanh.f32 %v892_v50  ;;  %v1712_v29 = vpop.f32.mrf.mxu0 }
 0x12f   :  { %v1714_v0 = vpop.f32.mrf.mxu1  ;;  %v1319_v35 = vpop.eup %1318  ;;  %1201 = vst [vmem:[#allocation9 + $0x60] sm:$0xff] %v1137_v59  ;;  %v1138_v42 = vmul.f32 %v1074_v20, %v1631_v8  ;;  %v1077_v38 = vmul.f32 0.5, %v1013_v21  ;;  %v1014_v3 = vadd.f32 1.0, %v1317_v22  ;;  %v1719_v39 = vadd.f32 %v1567_v25, %v1659_v63 }
 0x130   :  { %1203 = vst [vmem:[#allocation9 + $0x70] sm:$0xff] %v1139_v37  ;;  %v1140_v4 = vmul.f32 %v1076_v60, %v1634_v9  ;;  %v1079_v40 = vmul.f32 0.5, %v1015_v24  ;;  %v1016_v41 = vadd.f32 1.0, %v1319_v35  ;;  %v1724_v43 = vadd.f32 %v1569_v26, %v1661_v1  ;;  %v1726_v44 = vpop.f32.mrf.mxu0 }
 0x131   :  { %v1728_v51 = vpop.f32.mrf.mxu1  ;;  %1202 = vst [vmem:[#allocation9 + $0x68] sm:$0xff] %v1138_v42  ;;  %v1141_v8 = vmul.f32 %v1077_v38, %v1640_v15  ;;  %v1078_v52 = vmul.f32 0.5, %v1014_v3  ;;  %v893_v63 = vmul.f32 0.851, %v1719_v39  ;;  %v1734_v53 = vadd.f32 %v1571_v27, %v1671_v14 }
 0x132   :  { %1204 = vst [vmem:[#allocation9 + $0x78] sm:$0xff] %v1140_v4  ;;  %v1143_v9 = vmul.f32 %v1079_v40, %v1643_v17  ;;  %v1080_v47 = vmul.f32 0.5, %v1016_v41  ;;  %v895_v1 = vmul.f32 0.851, %v1724_v43  ;;  %v1740_v57 = vadd.f32 %v1573_v28, %v1673_v16  ;;  %v1742_v48 = vpop.f32.mrf.mxu0 }
 0x133   :  { %1205 = vst [vmem:[#allocation9 + $0x80] sm:$0xff] %v1141_v8  ;;  %v1142_v15 = vmul.f32 %v1078_v52, %v1647_v23  ;;  %1328 = vtanh.f32 %v893_v63  ;;  %v894_v58 = vmul.f32 0.851, %v1734_v53  ;;  %v1748_v14 = vadd.f32 %v1567_v25, %v1679_v33  ;;  %v1750_v17 = vpop.f32.mrf.mxu1 }
 0x134   :  { %v1321_v61 = vpop.eup %1320  ;;  %1207 = vst [vmem:[#allocation9 + $0x90] sm:$0xff] %v1143_v9  ;;  %v1144_v54 = vmul.f32 %v1080_v47, %v1651_v32  ;;  %1330 = vtanh.f32 %v895_v1  ;;  %v896_v16 = vmul.f32 0.851, %v1740_v57  ;;  %v1756_v6 = vadd.f32 %v1569_v26, %v1681_v34  ;;  %v394_v34 = vpop.f32.mrf.mxu0 }
 0x135   :  { %v1323_v23 = vpop.eup %1322  ;;  %1206 = vst [vmem:[#allocation9 + $0x88] sm:$0xff] %v1142_v15  ;;  %v1017_v49 = vadd.f32 1.0, %v1321_v61  ;;  %1332 = vtanh.f32 %v894_v58  ;;  %v897_v33 = vmul.f32 0.851, %v1748_v14  ;;  %v1761_v7 = vadd.f32 %v1571_v27, %v1685_v45  ;;  %v555_v45 = vpop.f32.mrf.mxu1 }
 0x136   :  { %1208 = vst [vmem:[#allocation9 + $0x98] sm:$0xff] %v1144_v54  ;;  %v1019_v10 = vadd.f32 1.0, %v1323_v23  ;;  %1334 = vtanh.f32 %v896_v16  ;;  %v899_v32 = vmul.f32 0.851, %v1756_v6  ;;  %v1766_v31 = vadd.f32 %v1573_v28, %v1687_v46 }
 0x137   :  { %v1081_v55 = vmul.f32 0.5, %v1017_v49  ;;  %1336 = vtanh.f32 %v897_v33  ;;  %v898_v11 = vmul.f32 0.851, %v1761_v7  ;;  %v1771_v12 = vadd.f32 %v1567_v25, %v1698_v2 }
 0x138   :  { %v1083_v50 = vmul.f32 0.5, %v1019_v10  ;;  %1338 = vtanh.f32 %v899_v32  ;;  %v900_v19 = vmul.f32 0.851, %v1766_v31  ;;  %v1776_v59 = vadd.f32 %v1569_v26, %v1700_v5  ;;  %v1790_v5 = vpop.f32.mrf.mxu0 }
 0x139   :  { %v1145_v46 = vmul.f32 %v1081_v55, %v1665_v30  ;;  %1340 = vtanh.f32 %v898_v11  ;;  %v901_v20 = vmul.f32 0.851, %v1771_v12  ;;  %v1782_v21 = vadd.f32 %v1571_v27, %v1706_v18 }
 0x13a   :  { %v1325_v2 = vpop.eup %1324  ;;  %v1147_v22 = vmul.f32 %v1083_v50, %v1669_v13  ;;  %1342 = vtanh.f32 %v900_v19  ;;  %v903_v37 = vmul.f32 0.851, %v1776_v59  ;;  %v1788_v60 = vadd.f32 %v1573_v28, %v1708_v36  ;;  %v1797_v13 = vpop.f32.mrf.mxu1 }
 0x13b   :  { %v1327_v30 = vpop.eup %1326  ;;  %1209 = vst [vmem:[#allocation9 + $0xa0] sm:$0xff] %v1145_v46  ;;  %v1018_v24 = vadd.f32 1.0, %v1325_v2  ;;  %1344 = vtanh.f32 %v901_v20  ;;  %v902_v35 = vmul.f32 0.851, %v1782_v21  ;;  %v1795_v18 = vadd.f32 %v1567_v25, %v1712_v29  ;;  %v1814_v52 = vpop.f32.mrf.mxu0 }
 0x13c   :  { %1211 = vst [vmem:[#allocation9 + $0xb0] sm:$0xff] %v1147_v22  ;;  %v1020_v42 = vadd.f32 1.0, %v1327_v30  ;;  %1346 = vtanh.f32 %v903_v37  ;;  %v904_v36 = vmul.f32 0.851, %v1788_v60  ;;  %v1802_v38 = vadd.f32 %v1569_v26, %v1714_v0 }
 0x13d   :  { %v1082_v3 = vmul.f32 0.5, %v1018_v24  ;;  %1348 = vtanh.f32 %v902_v35  ;;  %v905_v4 = vmul.f32 0.851, %v1795_v18  ;;  %v1807_v40 = vadd.f32 %v1571_v27, %v1726_v44  ;;  %v1822_v44 = vpop.f32.mrf.mxu1 }
 0x13e   :  { %v1084_v29 = vmul.f32 0.5, %v1020_v42  ;;  %1350 = vtanh.f32 %v904_v36  ;;  %v907_v41 = vmul.f32 0.851, %v1802_v38  ;;  %v1812_v8 = vadd.f32 %v1573_v28, %v1728_v51 }
 0x13f   :  { %v1146_v0 = vmul.f32 %v1082_v3, %v1691_v56  ;;  %1352 = vtanh.f32 %v905_v4  ;;  %v906_v63 = vmul.f32 0.851, %v1807_v40  ;;  %v1820_v9 = vadd.f32 %v1567_v25, %v1742_v48  ;;  %v1841_v55 = vpop.f32.mrf.mxu1 }
 0x140   :  { %v1329_v47 = vpop.eup %1328  ;;  %v1148_v1 = vmul.f32 %v1084_v29, %v1696_v62  ;;  %1354 = vtanh.f32 %v907_v41  ;;  %v908_v51 = vmul.f32 0.851, %v1812_v8  ;;  %v1828_v15 = vadd.f32 %v1569_v26, %v1750_v17  ;;  %v1838_v17 = vpop.f32.mrf.mxu0 }
 0x141   :  { %v1331_v56 = vpop.eup %1330  ;;  %1210 = vst [vmem:[#allocation9 + $0xa8] sm:$0xff] %v1146_v0  ;;  %v1021_v58 = vadd.f32 1.0, %v1329_v47  ;;  %1356 = vtanh.f32 %v906_v63  ;;  %v909_v61 = vmul.f32 0.851, %v1820_v9  ;;  %v1832_v48 = vadd.f32 %v1571_v27, %v394_v34  ;;  %v1853_v29 = vpop.f32.mrf.mxu1 }
 0x142   :  { %v1333_v54 = vpop.eup %1332  ;;  %1212 = vst [vmem:[#allocation9 + $0xb8] sm:$0xff] %v1148_v1  ;;  %v1023_v16 = vadd.f32 1.0, %v1331_v56  ;;  %1358 = vtanh.f32 %v908_v51  ;;  %v911_v62 = vmul.f32 0.851, %v1828_v15  ;;  %v1836_v23 = vadd.f32 %v1573_v28, %v555_v45  ;;  %v1846_v35 = vpop.f32.mrf.mxu0 }
 0x143   :  { %v1335_v49 = vpop.eup %1334  ;;  %v1085_v33 = vmul.f32 0.5, %v1021_v58  ;;  %v1022_v10 = vadd.f32 1.0, %v1333_v54  ;;  %1360 = vtanh.f32 %v909_v61  ;;  %v910_v32 = vmul.f32 0.851, %v1832_v48 }
 0x144   :  { %v1337_v34 = vpop.eup %1336  ;;  %v1087_v11 = vmul.f32 0.5, %v1023_v16  ;;  %v1024_v50 = vadd.f32 1.0, %v1335_v49  ;;  %1362 = vtanh.f32 %v911_v62  ;;  %v912_v19 = vmul.f32 0.851, %v1836_v23  ;;  %v1864_v62 = vpop.f32.mrf.mxu0 }
 0x145   :  { %v1339_v46 = vpop.eup %1338  ;;  %v1149_v45 = vmul.f32 %v1085_v33, %v1719_v39  ;;  %v1086_v20 = vmul.f32 0.5, %v1022_v10  ;;  %v1025_v2 = vadd.f32 1.0, %v1337_v34  ;;  %1364 = vtanh.f32 %v910_v32  ;;  %v1867_v10 = vpop.f32.mrf.mxu1 }
 0x146   :  { %v1341_v22 = vpop.eup %1340  ;;  %v1151_v37 = vmul.f32 %v1087_v11, %v1724_v43  ;;  %v1088_v30 = vmul.f32 0.5, %v1024_v50  ;;  %v1027_v24 = vadd.f32 1.0, %v1339_v46  ;;  %1366 = vtanh.f32 %v912_v19 }
 0x147   :  { %v1343_v42 = vpop.eup %1342  ;;  %1213 = vst [vmem:[#allocation9 + $0xc0] sm:$0xff] %v1149_v45  ;;  %v1150_v36 = vmul.f32 %v1086_v20, %v1734_v53  ;;  %v1089_v3 = vmul.f32 0.5, %v1025_v2  ;;  %v1026_v4 = vadd.f32 1.0, %v1341_v22  ;;  %v1851_v39 = vadd.f32 %v1567_v25, %v1790_v5 }
 0x148   :  { %v1345_v41 = vpop.eup %1344  ;;  %1215 = vst [vmem:[#allocation9 + $0xd0] sm:$0xff] %v1151_v37  ;;  %v1152_v43 = vmul.f32 %v1088_v30, %v1740_v57  ;;  %v1091_v0 = vmul.f32 0.5, %v1027_v24  ;;  %v1028_v63 = vadd.f32 1.0, %v1343_v42  ;;  %v1858_v47 = vadd.f32 %v1569_v26, %v1797_v13  ;;  %v1880_v30 = vpop.f32.mrf.mxu0 }
 0x149   :  { %v1347_v1 = vpop.eup %1346  ;;  %1214 = vst [vmem:[#allocation9 + $0xc8] sm:$0xff] %v1150_v36  ;;  %v1153_v53 = vmul.f32 %v1089_v3, %v1748_v14  ;;  %v1090_v51 = vmul.f32 0.5, %v1026_v4  ;;  %v1029_v56 = vadd.f32 1.0, %v1345_v41  ;;  %v913_v5 = vmul.f32 0.851, %v1851_v39  ;;  %v1884_v3 = vpop.f32.mrf.mxu1 }
 0x14a   :  { %v1349_v58 = vpop.eup %1348  ;;  %1216 = vst [vmem:[#allocation9 + $0xd8] sm:$0xff] %v1152_v43  ;;  %v1155_v61 = vmul.f32 %v1091_v0, %v1756_v6  ;;  %v1092_v54 = vmul.f32 0.5, %v1028_v63  ;;  %v1031_v57 = vadd.f32 1.0, %v1347_v1  ;;  %v915_v16 = vmul.f32 0.851, %v1858_v47 }
 0x14b   :  { %v1351_v13 = vpop.eup %1350  ;;  %1217 = vst [vmem:[#allocation9 + $0xe0] sm:$0xff] %v1153_v53  ;;  %v1154_v49 = vmul.f32 %v1090_v51, %v1761_v7  ;;  %v1093_v33 = vmul.f32 0.5, %v1029_v56  ;;  %v1030_v14 = vadd.f32 1.0, %v1349_v58  ;;  %1368 = vtanh.f32 %v913_v5  ;;  %v416_v58 = vpop.f32.mrf.mxu0 }
 0x14c   :  { %v1353_v32 = vpop.eup %1352  ;;  %1219 = vst [vmem:[#allocation9 + $0xf0] sm:$0xff] %v1155_v61  ;;  %v1156_v34 = vmul.f32 %v1092_v54, %v1766_v31  ;;  %v1095_v6 = vmul.f32 0.5, %v1031_v57  ;;  %v1032_v11 = vadd.f32 1.0, %v1351_v13  ;;  %1370 = vtanh.f32 %v915_v16  ;;  %v577_v16 = vpop.f32.mrf.mxu1 }
 0x14d   :  { %v1355_v50 = vpop.eup %1354  ;;  %1218 = vst [vmem:[#allocation9 + $0xe8] sm:$0xff] %v1154_v49  ;;  %v1157_v19 = vmul.f32 %v1093_v33, %v1771_v12  ;;  %v1094_v46 = vmul.f32 0.5, %v1030_v14  ;;  %v1033_v45 = vadd.f32 1.0, %v1353_v32  ;;  %v1873_v7 = vadd.f32 %v1571_v27, %v1814_v52 }
 0x14e   :  { %v1357_v20 = vpop.eup %1356  ;;  %1220 = vst [vmem:[#allocation9 + $0xf8] sm:$0xff] %v1156_v34  ;;  %v1159_v2 = vmul.f32 %v1095_v6, %v1776_v59  ;;  %v1096_v22 = vmul.f32 0.5, %v1032_v11  ;;  %v1035_v37 = vadd.f32 1.0, %v1355_v50  ;;  %v1878_v31 = vadd.f32 %v1573_v28, %v1822_v44  ;;  %v418_v11 = vpop.f32.mrf.mxu0 }
 0x14f   :  { %v1359_v24 = vpop.eup %1358  ;;  %1221 = vst [vmem:[#allocation9 + $0x100] sm:$0xff] %v1157_v19  ;;  %v1158_v12 = vmul.f32 %v1094_v46, %v1782_v21  ;;  %v1097_v42 = vmul.f32 0.5, %v1033_v45  ;;  %v1034_v36 = vadd.f32 1.0, %v1357_v20  ;;  %v914_v52 = vmul.f32 0.851, %v1873_v7  ;;  %v579_v19 = vpop.f32.mrf.mxu1 }
 0x150   :  { %v1361_v4 = vpop.eup %1360  ;;  %1223 = vst [vmem:[#allocation9 + $0x110] sm:$0xff] %v1159_v2  ;;  %v1160_v59 = vmul.f32 %v1096_v22, %v1788_v60  ;;  %v1099_v41 = vmul.f32 0.5, %v1035_v37  ;;  %v1036_v43 = vadd.f32 1.0, %v1359_v24  ;;  %v916_v44 = vmul.f32 0.851, %v1878_v31 }
 0x151   :  { %v1363_v0 = vpop.eup %1362  ;;  %1222 = vst [vmem:[#allocation9 + $0x108] sm:$0xff] %v1158_v12  ;;  %v1161_v63 = vmul.f32 %v1097_v42, %v1795_v18  ;;  %v1098_v1 = vmul.f32 0.5, %v1034_v36  ;;  %v1037_v21 = vadd.f32 1.0, %v1361_v4  ;;  %1372 = vtanh.f32 %v914_v52  ;;  %v583_v36 = vpop.f32.mrf.mxu1 }
 0x152   :  { %v1365_v53 = vpop.eup %1364  ;;  %1224 = vst [vmem:[#allocation9 + $0x118] sm:$0xff] %v1160_v59  ;;  %v1163_v51 = vmul.f32 %v1099_v41, %v1802_v38  ;;  %v1100_v56 = vmul.f32 0.5, %v1036_v43  ;;  %v1039_v5 = vadd.f32 1.0, %v1363_v0  ;;  %1374 = vtanh.f32 %v916_v44 }
 0x153   :  { %v1367_v60 = vpop.eup %1366  ;;  %1225 = vst [vmem:[#allocation9 + $0x120] sm:$0xff] %v1161_v63  ;;  %v1162_v61 = vmul.f32 %v1098_v1, %v1807_v40  ;;  %v1101_v54 = vmul.f32 0.5, %v1037_v21  ;;  %v1038_v57 = vadd.f32 1.0, %v1365_v53  ;;  %v1893_v18 = vadd.f32 %v1567_v25, %v1838_v17 }
 0x154   :  { %1227 = vst [vmem:[#allocation9 + $0x130] sm:$0xff] %v1163_v51  ;;  %v1164_v13 = vmul.f32 %v1100_v56, %v1812_v8  ;;  %v1103_v49 = vmul.f32 0.5, %v1039_v5  ;;  %v1040_v38 = vadd.f32 1.0, %v1367_v60  ;;  %v1898_v33 = vadd.f32 %v1569_v26, %v1841_v55  ;;  %v585_v56 = vpop.f32.mrf.mxu1 }
 0x155   :  { %1226 = vst [vmem:[#allocation9 + $0x128] sm:$0xff] %v1162_v61  ;;  %v1165_v14 = vmul.f32 %v1101_v54, %v1820_v9  ;;  %v1102_v40 = vmul.f32 0.5, %v1038_v57  ;;  %v917_v32 = vmul.f32 0.851, %v1893_v18  ;;  %v1904_v17 = vadd.f32 %v1571_v27, %v1846_v35 }
 0x156   :  { %1228 = vst [vmem:[#allocation9 + $0x138] sm:$0xff] %v1164_v13  ;;  %v1167_v34 = vmul.f32 %v1103_v49, %v1828_v15  ;;  %v1104_v8 = vmul.f32 0.5, %v1040_v38  ;;  %v919_v6 = vmul.f32 0.851, %v1898_v33  ;;  %v1910_v55 = vadd.f32 %v1573_v28, %v1853_v29 }
 0x157   :  { %1229 = vst [vmem:[#allocation9 + $0x140] sm:$0xff] %v1165_v14  ;;  %v1166_v9 = vmul.f32 %v1102_v40, %v1832_v48  ;;  %1376 = vtanh.f32 %v917_v32  ;;  %v918_v50 = vmul.f32 0.851, %v1904_v17  ;;  %v1916_v35 = vadd.f32 %v1567_v25, %v1864_v62 }
 0x158   :  { %v1369_v15 = vpop.eup %1368  ;;  %1231 = vst [vmem:[#allocation9 + $0x150] sm:$0xff] %v1167_v34  ;;  %v1168_v46 = vmul.f32 %v1104_v8, %v1836_v23  ;;  %1378 = vtanh.f32 %v919_v6  ;;  %v920_v29 = vmul.f32 0.851, %v1910_v55  ;;  %v1922_v45 = vadd.f32 %v1569_v26, %v1867_v10  ;;  %v422_v10 = vpop.f32.mrf.mxu0 }
 0x159   :  { %v1371_v48 = vpop.eup %1370  ;;  %1230 = vst [vmem:[#allocation9 + $0x148] sm:$0xff] %v1166_v9  ;;  %v1041_v20 = vadd.f32 1.0, %v1369_v15  ;;  %1380 = vtanh.f32 %v918_v50  ;;  %v921_v2 = vmul.f32 0.851, %v1916_v35  ;;  %v1927_v62 = vadd.f32 %v1571_v27, %v1880_v30 }
 0x15a   :  { %1232 = vst [vmem:[#allocation9 + $0x158] sm:$0xff] %v1168_v46  ;;  %v1043_v22 = vadd.f32 1.0, %v1371_v48  ;;  %1382 = vtanh.f32 %v920_v29  ;;  %v923_v23 = vmul.f32 0.851, %v1922_v45  ;;  %v1932_v37 = vadd.f32 %v1573_v28, %v1884_v3  ;;  %v424_v1 = vpop.f32.mrf.mxu0 }
 0x15b   :  { %v1105_v24 = vmul.f32 0.5, %v1041_v20  ;;  %1384 = vtanh.f32 %v921_v2  ;;  %v922_v12 = vmul.f32 0.851, %v1927_v62  ;;  %v1936_v42 = vadd.f32 %v1567_v25, %v416_v58 }
 0x15c   :  { %v1107_v30 = vmul.f32 0.5, %v1043_v22  ;;  %1386 = vtanh.f32 %v923_v23  ;;  %v924_v52 = vmul.f32 0.851, %v1932_v37  ;;  %v1940_v4 = vadd.f32 %v1569_v26, %v577_v16 }
 0x15d   :  { %v1169_v59 = vmul.f32 %v1105_v24, %v1851_v39  ;;  %1388 = vtanh.f32 %v922_v12  ;;  %v925_v3 = vmul.f32 0.851, %v1936_v42  ;;  %v1945_v41 = vadd.f32 %v1571_v27, %v418_v11 }
 0x15e   :  { %v1373_v43 = vpop.eup %1372  ;;  %v1171_v44 = vmul.f32 %v1107_v30, %v1858_v47  ;;  %1390 = vtanh.f32 %v924_v52  ;;  %v927_v0 = vmul.f32 0.851, %v1940_v4  ;;  %v1950_v63 = vadd.f32 %v1573_v28, %v579_v19 }
 0x15f   :  { %v1375_v21 = vpop.eup %1374  ;;  %1233 = vst [vmem:[#allocation9 + $0x160] sm:$0xff] %v1169_v59  ;;  %v1042_v53 = vadd.f32 1.0, %v1373_v43  ;;  %1392 = vtanh.f32 %v925_v3  ;;  %v926_v39 = vmul.f32 0.851, %v1945_v41  ;;  %v1954_v51 = vadd.f32 %v1567_v25, %v422_v10 }
 0x160   :  { %1235 = vst [vmem:[#allocation9 + $0x170] sm:$0xff] %v1171_v44  ;;  %v1044_v5 = vadd.f32 1.0, %v1375_v21  ;;  %1394 = vtanh.f32 %v927_v0  ;;  %v928_v47 = vmul.f32 0.851, %v1950_v63  ;;  %v1958_v58 = vadd.f32 %v1569_v26, %v583_v36 }
 0x161   :  { %v1106_v60 = vmul.f32 0.5, %v1042_v53  ;;  %1396 = vtanh.f32 %v926_v39  ;;  %v929_v61 = vmul.f32 0.851, %v1954_v51  ;;  %v1962_v54 = vadd.f32 %v1571_v27, %v424_v1 }
 0x162   :  { %v1108_v57 = vmul.f32 0.5, %v1044_v5  ;;  %1398 = vtanh.f32 %v928_v47  ;;  %v931_v25 = vmul.f32 0.851, %v1958_v58  ;;  %v1966_v16 = vadd.f32 %v1573_v28, %v585_v56 }
 0x163   :  { %v1170_v13 = vmul.f32 %v1106_v60, %v1873_v7  ;;  %1400 = vtanh.f32 %v929_v61  ;;  %v930_v26 = vmul.f32 0.851, %v1962_v54 }
 0x164   :  { %v1377_v49 = vpop.eup %1376  ;;  %v1172_v38 = vmul.f32 %v1108_v57, %v1878_v31  ;;  %1402 = vtanh.f32 %v931_v25  ;;  %v932_v14 = vmul.f32 0.851, %v1966_v16 }
 0x165   :  { %v1379_v27 = vpop.eup %1378  ;;  %1234 = vst [vmem:[#allocation9 + $0x168] sm:$0xff] %v1170_v13  ;;  %v1045_v40 = vadd.f32 1.0, %v1377_v49  ;;  %1404 = vtanh.f32 %v930_v26 }
 0x166   :  { %v1381_v32 = vpop.eup %1380  ;;  %1236 = vst [vmem:[#allocation9 + $0x178] sm:$0xff] %v1172_v38  ;;  %v1047_v34 = vadd.f32 1.0, %v1379_v27  ;;  %1406 = vtanh.f32 %v932_v14 }
 0x167   :  { %v1383_v28 = vpop.eup %1382  ;;  %v1109_v8 = vmul.f32 0.5, %v1045_v40  ;;  %v1046_v7 = vadd.f32 1.0, %v1381_v32 }
 0x168   :  { %v1385_v6 = vpop.eup %1384  ;;  %v1111_v11 = vmul.f32 0.5, %v1047_v34  ;;  %v1048_v9 = vadd.f32 1.0, %v1383_v28 }
 0x169   :  { %v1387_v50 = vpop.eup %1386  ;;  %v1173_v31 = vmul.f32 %v1109_v8, %v1893_v18  ;;  %v1110_v19 = vmul.f32 0.5, %v1046_v7  ;;  %v1049_v15 = vadd.f32 1.0, %v1385_v6 }
 0x16a   :  { %v1389_v46 = vpop.eup %1388  ;;  %v1175_v29 = vmul.f32 %v1111_v11, %v1898_v33  ;;  %v1112_v48 = vmul.f32 0.5, %v1048_v9  ;;  %v1051_v20 = vadd.f32 1.0, %v1387_v50 }
 0x16b   :  { %v1391_v2 = vpop.eup %1390  ;;  %1237 = vst [vmem:[#allocation9 + $0x180] sm:$0xff] %v1173_v31  ;;  %v1174_v22 = vmul.f32 %v1110_v19, %v1904_v17  ;;  %v1113_v23 = vmul.f32 0.5, %v1049_v15  ;;  %v1050_v10 = vadd.f32 1.0, %v1389_v46 }
 0x16c   :  { %v1393_v24 = vpop.eup %1392  ;;  %1239 = vst [vmem:[#allocation9 + $0x190] sm:$0xff] %v1175_v29  ;;  %v1176_v12 = vmul.f32 %v1112_v48, %v1910_v55  ;;  %v1115_v36 = vmul.f32 0.5, %v1051_v20  ;;  %v1052_v30 = vadd.f32 1.0, %v1391_v2 }
 0x16d   :  { %v1395_v18 = vpop.eup %1394  ;;  %1238 = vst [vmem:[#allocation9 + $0x188] sm:$0xff] %v1174_v22  ;;  %v1177_v52 = vmul.f32 %v1113_v23, %v1916_v35  ;;  %v1114_v59 = vmul.f32 0.5, %v1050_v10  ;;  %v1053_v33 = vadd.f32 1.0, %v1393_v24 }
 0x16e   :  { %v1397_v3 = vpop.eup %1396  ;;  %1240 = vst [vmem:[#allocation9 + $0x198] sm:$0xff] %v1176_v12  ;;  %v1179_v43 = vmul.f32 %v1115_v36, %v1922_v45  ;;  %v1116_v44 = vmul.f32 0.5, %v1052_v30  ;;  %v1055_v17 = vadd.f32 1.0, %v1395_v18 }
 0x16f   :  { %v1399_v0 = vpop.eup %1398  ;;  %1241 = vst [vmem:[#allocation9 + $0x1a0] sm:$0xff] %v1177_v52  ;;  %v1178_v1 = vmul.f32 %v1114_v59, %v1927_v62  ;;  %v1117_v21 = vmul.f32 0.5, %v1053_v33  ;;  %v1054_v55 = vadd.f32 1.0, %v1397_v3 }
 0x170   :  { %v1401_v53 = vpop.eup %1400  ;;  %1243 = vst [vmem:[#allocation9 + $0x1b0] sm:$0xff] %v1179_v43  ;;  %v1180_v39 = vmul.f32 %v1116_v44, %v1932_v37  ;;  %v1119_v56 = vmul.f32 0.5, %v1055_v17  ;;  %v1056_v35 = vadd.f32 1.0, %v1399_v0 }
 0x171   :  { %v1403_v5 = vpop.eup %1402  ;;  %1242 = vst [vmem:[#allocation9 + $0x1a8] sm:$0xff] %v1178_v1  ;;  %v1181_v47 = vmul.f32 %v1117_v21, %v1936_v42  ;;  %v1118_v60 = vmul.f32 0.5, %v1054_v55  ;;  %v1057_v45 = vadd.f32 1.0, %v1401_v53 }
 0x172   :  { %v1405_v61 = vpop.eup %1404  ;;  %1244 = vst [vmem:[#allocation9 + $0x1b8] sm:$0xff] %v1180_v39  ;;  %v1183_v57 = vmul.f32 %v1119_v56, %v1940_v4  ;;  %v1120_v25 = vmul.f32 0.5, %v1056_v35  ;;  %v1059_v62 = vadd.f32 1.0, %v1403_v5 }
 0x173   :  { %v1407_v13 = vpop.eup %1406  ;;  %1245 = vst [vmem:[#allocation9 + $0x1c0] sm:$0xff] %v1181_v47  ;;  %v1182_v26 = vmul.f32 %v1118_v60, %v1945_v41  ;;  %v1121_v49 = vmul.f32 0.5, %v1057_v45  ;;  %v1058_v37 = vadd.f32 1.0, %v1405_v61 }
 0x174   :  { %1247 = vst [vmem:[#allocation9 + $0x1d0] sm:$0xff] %v1183_v57  ;;  %v1184_v38 = vmul.f32 %v1120_v25, %v1950_v63  ;;  %v1123_v14 = vmul.f32 0.5, %v1059_v62  ;;  %v1060_v27 = vadd.f32 1.0, %v1407_v13 }
 0x175   :  { %1246 = vst [vmem:[#allocation9 + $0x1c8] sm:$0xff] %v1182_v26  ;;  %v1185_v42 = vmul.f32 %v1121_v49, %v1954_v51  ;;  %v1122_v40 = vmul.f32 0.5, %v1058_v37 }
 0x176   :  { %1248 = vst [vmem:[#allocation9 + $0x1d8] sm:$0xff] %v1184_v38  ;;  %v1187_v4 = vmul.f32 %v1123_v14, %v1958_v58  ;;  %v1124_v32 = vmul.f32 0.5, %v1060_v27 }
 0x177   :  { %1249 = vst [vmem:[#allocation9 + $0x1e0] sm:$0xff] %v1185_v42  ;;  %v1186_v41 = vmul.f32 %v1122_v40, %v1962_v54 }
 0x178   :  { %1251 = vst [vmem:[#allocation9 + $0x1f0] sm:$0xff] %v1187_v4  ;;  %v1188_v34 = vmul.f32 %v1124_v32, %v1966_v16 }
 0x179   :  { %1250 = vst [vmem:[#allocation9 + $0x1e8] sm:$0xff] %v1186_v41 }
 0x17a   :  { %1252 = vst [vmem:[#allocation9 + $0x1f8] sm:$0xff] %v1188_v34 }
 0x17b   :  { %1479 = shalt.err (!%p1476_p5)
}
 0x17c   :  { %1264 = dma.vmem_to_hbm [thread:$0]  %s1259_s2, 8192, %s1997_s3, [#allocation5], %s1495_s15, %s1495_s15, %s1496_s16  }
 0x17d   :  { %1492 = dma.done.wait [#allocation5], 8192  }
 0x17e   :  { %1493 = vsyncadd [#allocation5], 4294959104 }
 0x17f   :  { %1268 = vsyncpa [#allocation4], 1 }
 0x180   :  { %1269 = vsyncpa [#allocation7], 1 }
 0x181   :  { %1270 = vsyncpa [#allocation5], 1 }

</bundles_post_ra>
